<compile_context>
chip_gen: v7x
topology: tpu7x:2x2x1
jax: 0.10.0
libtpu: 0.0.40
codegen_flags: <defaults>
</compile_context>

<pallas_src>
import functools

import jax
import jax.numpy as jnp
from jax import lax
from jax.experimental import pallas as pl
from jax.experimental.pallas import tpu as pltpu

IN_F = 60        # timeseries * movement (fc1 in_features)
IN_F_PAD = 64    # K padded to a sublane-aligned size (zero rows in w1)
H1 = 128
H2 = 64
OUT_F = 1
LN_EPS = 1e-5


def _round_up(n, m):
    return ((n + m - 1) // m) * m


def _layernorm_1pass(h, gamma, beta):
    """One-pass LayerNorm: both reductions issue back-to-back on the XLU."""
    n = h.shape[-1]
    s = jnp.sum(h, axis=-1, keepdims=True)
    s2 = jnp.sum(h * h, axis=-1, keepdims=True)
    mu = s * (1.0 / n)
    var = s2 * (1.0 / n) - mu * mu
    return (h - mu) * lax.rsqrt(var + LN_EPS) * gamma + beta


def critic_kernel(x_ref, w1_ref, lnp1_ref, w2_ref, p2_ref, o_ref):
    # x:    (tb, 64)  bf16
    # w1:   (64, 128) bf16 (rows 60..63 are zero padding)
    # lnp1: (3, 128)  f32  = [b1; gamma1; beta1]
    # w2:   (128, 64) bf16
    # p2:   (5, 64)   f32  = [b2; gamma2; beta2; w3_row; b3_row]
    # o:    (1, tb)   f32  (lane-dense output slab)
    x = x_ref[...]

    # fc1 (bf16 MXU, f32 acc) -> layernorm1 -> relu
    h1 = jnp.dot(x, w1_ref[...], preferred_element_type=jnp.float32)
    h1 = h1 + lnp1_ref[0:1, :]
    h1 = _layernorm_1pass(h1, lnp1_ref[1:2, :], lnp1_ref[2:3, :])
    h1 = jnp.maximum(h1, 0.0).astype(jnp.bfloat16)

    # fc2 (bf16 MXU, f32 acc) -> layernorm2 -> relu (f32)
    h2 = jnp.dot(h1, w2_ref[...], preferred_element_type=jnp.float32)
    h2 = h2 + p2_ref[0:1, :]
    h2 = _layernorm_1pass(h2, p2_ref[1:2, :], p2_ref[2:3, :])
    h2 = jnp.maximum(h2, 0.0)

    # fc3 (out_features=1): put batch on lanes via a single transpose, then an
    # M=1 matmul against the fc3 weight row -> a lane-dense (1, tb) result.
    # This replaces per-row masked stores + a 4B-strided writeback DMA of a
    # (tb, 1) column with unmasked stores and one contiguous writeback.
    out_row = jnp.dot(p2_ref[3:4, :], h2.T,
                      preferred_element_type=jnp.float32) + p2_ref[4:5, 0:1]
    o_ref[...] = out_row.astype(o_ref.dtype)


@functools.partial(jax.jit, static_argnames=("tb",))
def critic_mlp(x_flat, params, *, tb=512):
    """x_flat: (B, 60) float32. Returns (B, 1) float32."""
    B = x_flat.shape[0]
    (w1, b1, g1, be1, w2, b2, g2, be2, w3, b3) = params

    Bp8 = _round_up(max(B, 1), 8)
    tb = max(int(tb), 8)
    if Bp8 <= tb:
        tb_eff = Bp8                    # single tile: no over-padding
    else:
        tb_eff = _round_up(tb, 128)     # multi-tile: lane-divisible out block
    B_pad = _round_up(Bp8, tb_eff)

    # Pack / pad / cast parameters (tiny; fused by XLA outside the kernel).
    w1p = (jnp.zeros((IN_F_PAD, H1), jnp.float32)
           .at[:IN_F, :].set(w1).astype(jnp.bfloat16))      # zero-row pad, bf16
    w2b = w2.astype(jnp.bfloat16)
    lnp1 = jnp.concatenate([b1, g1, be1], axis=0)            # (3, H1) f32
    p2 = jnp.concatenate(
        [b2, g2, be2, w3.T, jnp.broadcast_to(b3, (1, H2))], axis=0)  # (5, H2)

    # Batch-pad + K-pad the activations; cast matmul input to bf16.
    xb = jnp.zeros((B_pad, IN_F_PAD), jnp.bfloat16)
    xb = xb.at[:B, :IN_F].set(x_flat.astype(jnp.bfloat16))

    const = lambda i: (0, 0)   # weights / packed params resident across grid

    out = pl.pallas_call(
        critic_kernel,
        out_shape=jax.ShapeDtypeStruct((1, B_pad), jnp.float32),
        grid_spec=pltpu.PrefetchScalarGridSpec(
            num_scalar_prefetch=0,
            grid=(B_pad // tb_eff,),
            in_specs=[
                pl.BlockSpec((tb_eff, IN_F_PAD), lambda i: (i, 0)),
                pl.BlockSpec((IN_F_PAD, H1), const),
                pl.BlockSpec((3, H1), const),
                pl.BlockSpec((H1, H2), const),
                pl.BlockSpec((5, H2), const),
            ],
            out_specs=pl.BlockSpec((1, tb_eff), lambda i: (0, i)),
        ),
        compiler_params=pltpu.CompilerParams(
            dimension_semantics=("parallel",)),
    )(xb, w1p, lnp1, w2b, p2)

    return out[0, :B][:, None]


def init_params(key):
    """Deterministic synthetic parameters matching nn.Linear / nn.LayerNorm shapes."""
    ks = jax.random.split(key, 6)

    def linear(kw, kb, fan_in, fan_out):
        bound = 1.0 / jnp.sqrt(fan_in)
        w = jax.random.uniform(kw, (fan_in, fan_out), jnp.float32, -bound, bound)
        b = jax.random.uniform(kb, (1, fan_out), jnp.float32, -bound, bound)
        return w, b

    w1, b1 = linear(ks[0], ks[1], IN_F, H1)
    w2, b2 = linear(ks[2], ks[3], H1, H2)
    w3, b3 = linear(ks[4], ks[5], H2, OUT_F)
    # LayerNorm affine params (PyTorch default init: weight=1, bias=0)
    g1, be1 = jnp.ones((1, H1), jnp.float32), jnp.zeros((1, H1), jnp.float32)
    g2, be2 = jnp.ones((1, H2), jnp.float32), jnp.zeros((1, H2), jnp.float32)
    return (w1, b1, g1, be1, w2, b2, g2, be2, w3, b3)


def critic_forward(x_dict, params):
    """Mirrors CriticNetwork.forward semantics (glue in plain JAX)."""
    x_local = x_dict["local"]                          # [..., T, M, F]
    lead = x_local.shape[:-3]
    T, M, _ = x_local.shape[-3:]
    x_flat = x_local[..., 0].reshape(-1, T * M)        # (B, 60)
    out = critic_mlp(x_flat, params)                   # (B, 1)
    return out.reshape(*lead, -1)


def _layernorm_ref(h, gamma, beta):
    mu = jnp.mean(h, axis=-1, keepdims=True)
    var = jnp.mean((h - mu) * (h - mu), axis=-1, keepdims=True)
    return (h - mu) * lax.rsqrt(var + LN_EPS) * gamma + beta


def reference_forward(x_dict, params):
    """Module-faithful reference, using the same mixed precision as the kernel
    (bf16 matmul inputs, f32 accumulation and f32 vector math)."""
    (w1, b1, g1, be1, w2, b2, g2, be2, w3, b3) = params
    x_local = x_dict["local"]
    lead = x_local.shape[:-3]
    T, M, _ = x_local.shape[-3:]
    h = x_local[..., 0].reshape(-1, T * M)
    h = jnp.dot(h.astype(jnp.bfloat16), w1.astype(jnp.bfloat16),
                preferred_element_type=jnp.float32) + b1
    h = jnp.maximum(_layernorm_ref(h, g1, be1), 0.0)
    h = jnp.dot(h.astype(jnp.bfloat16), w2.astype(jnp.bfloat16),
                preferred_element_type=jnp.float32) + b2
    h = jnp.maximum(_layernorm_ref(h, g2, be2), 0.0)
    h = h @ w3 + b3
    return h.reshape(*lead, -1)


if __name__ == "__main__":
    key = jax.random.PRNGKey(0)
    k_x, k_p, k_x2 = jax.random.split(key, 3)

    params = init_params(k_p)

    # Small shape: env_batch=2, n_agents=4, timeseries=20, movement=3, feature_num=4
    x_local = jax.random.normal(k_x, (2, 4, 20, 3, 4), dtype=jnp.float32)
    out = jax.block_until_ready(critic_forward({"local": x_local}, params))
    ref = reference_forward({"local": x_local}, params)
    assert out.shape == (2, 4, 1), out.shape
    assert jnp.allclose(out, ref, atol=2e-3, rtol=2e-3)

    # Larger batch (B=640) to exercise 512-row tiles, batch padding and a
    # multi-step "parallel" grid (2 steps) with lane-dense output blocks.
    x_local2 = jax.random.normal(k_x2, (16, 40, 20, 3, 4), dtype=jnp.float32)
    out2 = jax.block_until_ready(critic_forward({"local": x_local2}, params))
    ref2 = reference_forward({"local": x_local2}, params)
    assert out2.shape == (16, 40, 1), out2.shape
    assert jnp.allclose(out2, ref2, atol=2e-3, rtol=2e-3)

    print("KERNEL_OK")
</pallas_src>

<mosaic_0001>
module attributes {stable_mosaic.version = 11 : i64} {
  func.func @critic_kernel(%arg0: i32, %arg1: memref<8x64xbf16, #tpu.memory_space<vmem>>, %arg2: memref<64x128xbf16, #tpu.memory_space<vmem>>, %arg3: memref<3x128xf32, #tpu.memory_space<vmem>>, %arg4: memref<128x64xbf16, #tpu.memory_space<vmem>>, %arg5: memref<5x64xf32, #tpu.memory_space<vmem>>, %arg6: memref<1x8xf32, #tpu.memory_space<vmem>>) attributes {dimension_semantics = [#tpu.dimension_semantics<parallel>], iteration_bounds = array<i64: 1>, scalar_prefetch = 0 : i64, scratch_operands = 0 : i64, tpu.core_type = #tpu.core_type<tc>, window_params = [{transform_indices = @transform_0, window_bounds = array<i64: 8, 64>}, {pipeline_mode = #tpu.pipeline_mode<synchronous>, transform_indices = @transform_1, window_bounds = array<i64: 64, 128>}, {pipeline_mode = #tpu.pipeline_mode<synchronous>, transform_indices = @transform_2, window_bounds = array<i64: 3, 128>}, {pipeline_mode = #tpu.pipeline_mode<synchronous>, transform_indices = @transform_3, window_bounds = array<i64: 128, 64>}, {pipeline_mode = #tpu.pipeline_mode<synchronous>, transform_indices = @transform_4, window_bounds = array<i64: 5, 64>}, {transform_indices = @transform_5, window_bounds = array<i64: 1, 8>}]} {
    %c0 = arith.constant 0 : index
    %c0_0 = arith.constant 0 : index
    %0 = vector.load %arg1[%c0, %c0_0] : memref<8x64xbf16, #tpu.memory_space<vmem>>, vector<8x64xbf16>
    %c0_1 = arith.constant 0 : index
    %c0_2 = arith.constant 0 : index
    %1 = vector.load %arg2[%c0_1, %c0_2] : memref<64x128xbf16, #tpu.memory_space<vmem>>, vector<64x128xbf16>
    %cst = arith.constant dense<0.000000e+00> : vector<8x128xf32>
    %2 = tpu.matmul %0, %1, %cst {dimension_numbers = #tpu.dot_dimension_numbers<[1], [0], [0], [1], [0, 0, 1, 1], [], []>} : vector<8x64xbf16>, vector<64x128xbf16>, vector<8x128xf32> -> vector<8x128xf32>
    %c0_3 = arith.constant 0 : index
    %c0_4 = arith.constant 0 : index
    %3 = vector.load %arg3[%c0_3, %c0_4] : memref<3x128xf32, #tpu.memory_space<vmem>>, vector<1x128xf32>
    %4 = vector.broadcast %3 : vector<1x128xf32> to vector<8x128xf32>
    %5 = arith.addf %2, %4 : vector<8x128xf32>
    %c1 = arith.constant 1 : index
    %c0_5 = arith.constant 0 : index
    %6 = vector.load %arg3[%c1, %c0_5] : memref<3x128xf32, #tpu.memory_space<vmem>>, vector<1x128xf32>
    %c2 = arith.constant 2 : index
    %c0_6 = arith.constant 0 : index
    %7 = vector.load %arg3[%c2, %c0_6] : memref<3x128xf32, #tpu.memory_space<vmem>>, vector<1x128xf32>
    %cst_7 = arith.constant dense<0.000000e+00> : vector<8xf32>
    %8 = vector.multi_reduction <add>, %5, %cst_7 [1] : vector<8x128xf32> to vector<8xf32>
    %9 = vector.shape_cast %8 : vector<8xf32> to vector<8x1xf32>
    %10 = arith.mulf %5, %5 : vector<8x128xf32>
    %cst_8 = arith.constant dense<0.000000e+00> : vector<8xf32>
    %11 = vector.multi_reduction <add>, %10, %cst_8 [1] : vector<8x128xf32> to vector<8xf32>
    %12 = vector.shape_cast %11 : vector<8xf32> to vector<8x1xf32>
    %cst_9 = arith.constant 7.812500e-03 : f32
    %13 = vector.broadcast %cst_9 : f32 to vector<8x1xf32>
    %14 = arith.mulf %9, %13 : vector<8x1xf32>
    %cst_10 = arith.constant 7.812500e-03 : f32
    %15 = vector.broadcast %cst_10 : f32 to vector<8x1xf32>
    %16 = arith.mulf %12, %15 : vector<8x1xf32>
    %17 = arith.mulf %14, %14 : vector<8x1xf32>
    %18 = arith.subf %16, %17 : vector<8x1xf32>
    %19 = vector.broadcast %14 : vector<8x1xf32> to vector<8x128xf32>
    %20 = arith.subf %5, %19 : vector<8x128xf32>
    %cst_11 = arith.constant 9.99999974E-6 : f32
    %21 = vector.broadcast %cst_11 : f32 to vector<8x1xf32>
    %22 = arith.addf %18, %21 : vector<8x1xf32>
    %23 = math.rsqrt %22 : vector<8x1xf32>
    %24 = vector.broadcast %23 : vector<8x1xf32> to vector<8x128xf32>
    %25 = arith.mulf %20, %24 : vector<8x128xf32>
    %26 = vector.broadcast %6 : vector<1x128xf32> to vector<8x128xf32>
    %27 = arith.mulf %25, %26 : vector<8x128xf32>
    %28 = vector.broadcast %7 : vector<1x128xf32> to vector<8x128xf32>
    %29 = arith.addf %27, %28 : vector<8x128xf32>
    %cst_12 = arith.constant 0.000000e+00 : f32
    %30 = vector.broadcast %cst_12 : f32 to vector<8x128xf32>
    %31 = arith.maximumf %29, %30 : vector<8x128xf32>
    %32 = arith.truncf %31 : vector<8x128xf32> to vector<8x128xbf16>
    %c0_13 = arith.constant 0 : index
    %c0_14 = arith.constant 0 : index
    %33 = vector.load %arg4[%c0_13, %c0_14] : memref<128x64xbf16, #tpu.memory_space<vmem>>, vector<128x64xbf16>
    %cst_15 = arith.constant dense<0.000000e+00> : vector<8x64xf32>
    %34 = tpu.matmul %32, %33, %cst_15 {dimension_numbers = #tpu.dot_dimension_numbers<[1], [0], [0], [1], [0, 0, 1, 1], [], []>} : vector<8x128xbf16>, vector<128x64xbf16>, vector<8x64xf32> -> vector<8x64xf32>
    %c0_16 = arith.constant 0 : index
    %c0_17 = arith.constant 0 : index
    %35 = vector.load %arg5[%c0_16, %c0_17] : memref<5x64xf32, #tpu.memory_space<vmem>>, vector<1x64xf32>
    %36 = vector.broadcast %35 : vector<1x64xf32> to vector<8x64xf32>
    %37 = arith.addf %34, %36 : vector<8x64xf32>
    %c1_18 = arith.constant 1 : index
    %c0_19 = arith.constant 0 : index
    %38 = vector.load %arg5[%c1_18, %c0_19] : memref<5x64xf32, #tpu.memory_space<vmem>>, vector<1x64xf32>
    %c2_20 = arith.constant 2 : index
    %c0_21 = arith.constant 0 : index
    %39 = vector.load %arg5[%c2_20, %c0_21] : memref<5x64xf32, #tpu.memory_space<vmem>>, vector<1x64xf32>
    %cst_22 = arith.constant dense<0.000000e+00> : vector<8xf32>
    %40 = vector.multi_reduction <add>, %37, %cst_22 [1] : vector<8x64xf32> to vector<8xf32>
    %41 = vector.shape_cast %40 : vector<8xf32> to vector<8x1xf32>
    %42 = arith.mulf %37, %37 : vector<8x64xf32>
    %cst_23 = arith.constant dense<0.000000e+00> : vector<8xf32>
    %43 = vector.multi_reduction <add>, %42, %cst_23 [1] : vector<8x64xf32> to vector<8xf32>
    %44 = vector.shape_cast %43 : vector<8xf32> to vector<8x1xf32>
    %cst_24 = arith.constant 1.562500e-02 : f32
    %45 = vector.broadcast %cst_24 : f32 to vector<8x1xf32>
    %46 = arith.mulf %41, %45 : vector<8x1xf32>
    %cst_25 = arith.constant 1.562500e-02 : f32
    %47 = vector.broadcast %cst_25 : f32 to vector<8x1xf32>
    %48 = arith.mulf %44, %47 : vector<8x1xf32>
    %49 = arith.mulf %46, %46 : vector<8x1xf32>
    %50 = arith.subf %48, %49 : vector<8x1xf32>
    %51 = vector.broadcast %46 : vector<8x1xf32> to vector<8x64xf32>
    %52 = arith.subf %37, %51 : vector<8x64xf32>
    %cst_26 = arith.constant 9.99999974E-6 : f32
    %53 = vector.broadcast %cst_26 : f32 to vector<8x1xf32>
    %54 = arith.addf %50, %53 : vector<8x1xf32>
    %55 = math.rsqrt %54 : vector<8x1xf32>
    %56 = vector.broadcast %55 : vector<8x1xf32> to vector<8x64xf32>
    %57 = arith.mulf %52, %56 : vector<8x64xf32>
    %58 = vector.broadcast %38 : vector<1x64xf32> to vector<8x64xf32>
    %59 = arith.mulf %57, %58 : vector<8x64xf32>
    %60 = vector.broadcast %39 : vector<1x64xf32> to vector<8x64xf32>
    %61 = arith.addf %59, %60 : vector<8x64xf32>
    %cst_27 = arith.constant 0.000000e+00 : f32
    %62 = vector.broadcast %cst_27 : f32 to vector<8x64xf32>
    %63 = arith.maximumf %61, %62 : vector<8x64xf32>
    %c3 = arith.constant 3 : index
    %c0_28 = arith.constant 0 : index
    %64 = vector.load %arg5[%c3, %c0_28] : memref<5x64xf32, #tpu.memory_space<vmem>>, vector<1x64xf32>
    %65 = tpu.transpose %63, [1, 0] : vector<8x64xf32> -> vector<64x8xf32>
    %cst_29 = arith.constant dense<0.000000e+00> : vector<1x8xf32>
    %66 = tpu.matmul %64, %65, %cst_29 {dimension_numbers = #tpu.dot_dimension_numbers<[1], [0], [0], [1], [0, 0, 1, 1], [], []>} : vector<1x64xf32>, vector<64x8xf32>, vector<1x8xf32> -> vector<1x8xf32>
    %c4 = arith.constant 4 : index
    %c0_30 = arith.constant 0 : index
    %67 = vector.load %arg5[%c4, %c0_30] : memref<5x64xf32, #tpu.memory_space<vmem>>, vector<1x1xf32>
    %68 = vector.broadcast %67 : vector<1x1xf32> to vector<1x8xf32>
    %69 = arith.addf %66, %68 : vector<1x8xf32>
    %c0_31 = arith.constant 0 : index
    %c0_32 = arith.constant 0 : index
    %70 = vector.load %arg6[%c0_31, %c0_32] : memref<1x8xf32, #tpu.memory_space<vmem>>, vector<1x8xf32>
    tpu.vector_store %arg6[%c0_31, %c0_32], %69 {strides = array<i32>} : memref<1x8xf32, #tpu.memory_space<vmem>>, vector<1x8xf32>,
    return
  }
  func.func @transform_0(%arg0: i32) -> (i32, i32) {
    %c0_i32 = arith.constant 0 : i32
    %c0_i32_0 = arith.constant 0 : i32
    return %arg0, %c0_i32 : i32, i32
  }
  func.func @transform_1(%arg0: i32) -> (i32, i32) {
    %c0_i32 = arith.constant 0 : i32
    %c0_i32_0 = arith.constant 0 : i32
    %c0_i32_1 = arith.constant 0 : i32
    return %c0_i32, %c0_i32_0 : i32, i32
  }
  func.func @transform_2(%arg0: i32) -> (i32, i32) {
    %c0_i32 = arith.constant 0 : i32
    %c0_i32_0 = arith.constant 0 : i32
    %c0_i32_1 = arith.constant 0 : i32
    return %c0_i32, %c0_i32_0 : i32, i32
  }
  func.func @transform_3(%arg0: i32) -> (i32, i32) {
    %c0_i32 = arith.constant 0 : i32
    %c0_i32_0 = arith.constant 0 : i32
    %c0_i32_1 = arith.constant 0 : i32
    return %c0_i32, %c0_i32_0 : i32, i32
  }
  func.func @transform_4(%arg0: i32) -> (i32, i32) {
    %c0_i32 = arith.constant 0 : i32
    %c0_i32_0 = arith.constant 0 : i32
    %c0_i32_1 = arith.constant 0 : i32
    return %c0_i32, %c0_i32_0 : i32, i32
  }
  func.func @transform_5(%arg0: i32) -> (i32, i32) {
    %c0_i32 = arith.constant 0 : i32
    %c0_i32_0 = arith.constant 0 : i32
    return %c0_i32, %arg0 : i32, i32
  }
}

</mosaic_0001>

<bundles_post_ra>
// kernel: critic_mlp.1
= control target key start
LH: loop header
LB: loop body
LE: loop exit
PB: predicated region body
PF: predicated region fallthrough
CT: control target
= control target key end

     0   :  { %v486_v1 = vmov 0.0   ;;  %vm487_vm0 = vmmov 0   ;;  %s603_s0 = inlined_call_operand.vmem [shape: bf16[8,64], index: 0, kind: input, shape index: {}]   ;;  %s604_s1 = inlined_call_operand.vmem [shape: bf16[64,128], index: 1, kind: input, shape index: {}]   ;;  %s605_s2 = inlined_call_operand.vmem [shape: f32[3,128], index: 2, kind: input, shape index: {}]   ;;  %s606_s3 = inlined_call_operand.vmem [shape: bf16[128,64], index: 3, kind: input, shape index: {}]   ;;  %s607_s4 = inlined_call_operand.vmem [shape: f32[5,64], index: 4, kind: input, shape index: {}]   ;;  %s608_s5 = inlined_call_operand.hbm [shape: f32[1,8], index: 5, kind: output, shape index: {}]  }
   0x1   :  { %v446_v0 = vld [vmem:[%s604_s1] sm:$0xff]   ;;  %404 = vmatprep.subr.bf16.mxu0 %v486_v1  ;;  %416 = vmatprep.subr.bf16.mxu1 %v486_v1  ;;  %v447_v2 = vld [vmem:[%s604_s1 + $0x8] sm:$0xff]   ;;  %v448_v3 = vld [vmem:[%s604_s1 + $0x10] sm:$0xff]  }
   0x2   :  { %405 = vmatpush3.bf16.msra.mxu0 %v446_v0  ;;  %412 = vmatprep.mubr.msk.bf16.mxu0 %vm487_vm0, %v486_v1  ;;  %v449_v4 = vld [vmem:[%s604_s1 + $0x18] sm:$0xff]  }
   0x3   :  { %406 = vmatprep.subr.bf16.mxu0 %v486_v1  ;;  %432 = vmatprep.mubr.msk.bf16.mxu1 %vm487_vm0, %v486_v1 }
   0x6   :  { %407 = vmatpush3.bf16.msra.mxu0 %v447_v2 }
   0x7   :  { %408 = vmatprep.subr.bf16.mxu0 %v486_v1 }
   0xa   :  { %409 = vmatpush3.bf16.msra.mxu0 %v448_v3 }
   0xb   :  { %10 = vsyncpa [#allocation3], 0  ;;  %410 = vmatprep.subr.bf16.mxu0 %v486_v1  ;;  %v22_v5 = vld [vmem:[%s603_s0] sm:$0xf]  ;;  %vm60_vm1 = vcmask 523264   ;;  %v451_v14 = vld [vmem:[%s606_s3 + $0x8] sm:$0xff]  }
   0xc   :  { %v367_v6 = vld [vmem:[%s605_s2] ss:$0 sm:$0xff]  ;;  %v452_v15 = vld [vmem:[%s606_s3 + $0x10] sm:$0xff]   ;;  %v453_v16 = vld [vmem:[%s606_s3 + $0x18] sm:$0xff]   ;;  %v488_v47 = vmov 0   ;;  %s489_s0 = smov [#allocation2]  }
   0xd   :  { %v450_v13 = vld [vmem:[%s606_s3] sm:$0xff]   ;;  %v455_v18 = vld [vmem:[%s606_s3 + $0x28] sm:$0xff]   ;;  %v456_v19 = vld [vmem:[%s606_s3 + $0x30] sm:$0xff]   ;;  %445 = vset.pattern.permute.xlu0 %v488_v47  ;;  %s359_s30 = sshll.u32 %s489_s0, 4  ;;  %vm351_vm2 = vcmask 57344   ;;  %s360_s30 = int_to_ptr.vmem [resolvable:$true] %s359_s30 }
   0xe   :  { %411 = vmatpush3.bf16.msra.mxu0 %v449_v4  ;;  %417 = vmatpush3.bf16.msra.mxu1 %v450_v13  ;;  %v454_v17 = vld [vmem:[%s606_s3 + $0x20] sm:$0xff]   ;;  %v457_v20 = vld [vmem:[%s606_s3 + $0x38] sm:$0xff]   ;;  %s462_s6 = scalar_lea.vmem %s360_s30, 16  ;;  %s466_s7 = scalar_lea.vmem %s360_s30, 32 }
   0xf   :  { %436 = vmatprep.subr.mxu0 %v486_v1  ;;  %418 = vmatprep.subr.bf16.mxu1 %v486_v1  ;;  %v373_v30 = vld [vmem:[%s605_s2 + $0x1] ss:$0 sm:$0xff]  ;;  %v374_v32 = vld [vmem:[%s605_s2 + $0x2] ss:$0 sm:$0xff]  ;;  %v375_v37 = vld [vmem:[%s607_s4] ss:$0 sm:$0xff]  ;;  %p463_p0 = scmp.ne.s32.totalorder %s360_s30, %s462_s6  ;;  %p467_p1 = scmp.lt.s32.totalorder %s360_s30, %s360_s30 }
  0x10   :  { %v269_v46 = vld [vmem:[%s607_s4 + $0x4] sm:$0x1]  ;;  %v384_v57 = vld [vmem:[%s607_s4 + $0x1] ss:$0 sm:$0xff]  ;;  %v385_v59 = vld [vmem:[%s607_s4 + $0x2] ss:$0 sm:$0xff]  ;;  %p468_p2 = scmp.lt.s32.totalorder %s466_s7, %s462_s6 }
  0x11   :  { %413 = vmatmul.mubr.msk.bf16.vlgmr.msra.gmra.mrb[0].mxu0 %vm60_vm1, %v22_v5  ;;  %v268_v63 = vld [vmem:[%s607_s4 + $0x3] sm:$0x1] }
  0x12   :  { %438 = vmatprep.mubr.msk.f32.mxu0 %vm487_vm0, %v486_v1  ;;  %419 = vmatpush3.bf16.msra.mxu1 %v451_v14  ;;  %p469_p3 = por %p468_p2, %p467_p1 }
  0x13   :  { %420 = vmatprep.subr.bf16.mxu1 %v486_v1 }
  0x14   :  { %p470_p4 = pnand %p469_p3, %p463_p0 }
  0x16   :  { %421 = vmatpush3.bf16.msra.mxu1 %v452_v15 }
  0x17   :  { %422 = vmatprep.subr.bf16.mxu1 %v486_v1 }
  0x1a   :  { %423 = vmatpush3.bf16.msra.mxu1 %v453_v16 }
  0x1b   :  { %424 = vmatprep.subr.bf16.mxu1 %v486_v1 }
  0x1e   :  { %425 = vmatpush3.bf16.msra.mxu1 %v454_v17 }
  0x1f   :  { %426 = vmatprep.subr.bf16.mxu1 %v486_v1 }
  0x22   :  { %427 = vmatpush3.bf16.msra.mxu1 %v455_v18 }
  0x23   :  { %428 = vmatprep.subr.bf16.mxu1 %v486_v1 }
  0x26   :  { %429 = vmatpush3.bf16.msra.mxu1 %v456_v19 }
  0x27   :  { %430 = vmatprep.subr.bf16.mxu1 %v486_v1 }
  0x2a   :  { %431 = vmatpush3.bf16.msra.mxu1 %v457_v20 }
  0xe4   :  { %v98_v7 = vpop.f32.mrb[0].mxu0 }
  0xe5   :  { %v99_v8 = vadd.f32 %v367_v6, %v98_v7  ;;  %v414_v9 = vpop.f32.mrb[1].mxu0 }
  0xe6   :  { %v101_v10 = vpop.f32.mrb[2].mxu0 }
  0xe7   :  { %106 = vadd.xlane.f32.xlu0 %v99_v8  ;;  %v415_v11 = vpop.f32.mrb[3].mxu0  ;;  %v108_v12 = vmul.f32 %v99_v8, %v99_v8 }
  0xeb   :  { %109 = vadd.xlane.f32.xlu0 %v108_v12 }
 0x101   :  { %272 = vperm.xlu0 %445, %v269_v46  }
 0x174   :  { %v107_v21 = vpop.xlane.xlu0 %106 }
 0x175   :  { %v111_v22 = vmul.f32 0.0078125, %v107_v21 }
 0x177   :  { %v113_v24 = vmul.f32 %v111_v22, %v111_v22  ;;  %v115_v28 = vsub.f32 %v99_v8, %v111_v22 }
 0x178   :  { %v110_v23 = vpop.xlane.xlu0 %109 }
 0x179   :  { %v112_v25 = vmul.f32 0.0078125, %v110_v23 }
 0x17b   :  { %v114_v26 = vsub.f32 %v112_v25, %v113_v24 }
 0x17d   :  { %v116_v27 = vadd.f32 1e-05, %v114_v26 }
 0x17f   :  { %458 = vrsqrt.f32 %v116_v27 }
 0x180   :  { %v273_v0 = vpop.permute.xlu0 %272 }
 0x189   :  { %v459_v29 = vpop.eup %458 }
 0x18a   :  { %v118_v31 = vmul.f32 %v459_v29, %v115_v28 }
 0x18c   :  { %v123_v33 = vmul.f32 %v373_v30, %v118_v31 }
 0x18e   :  { %v128_v34 = vadd.f32 %v374_v32, %v123_v33 }
 0x190   :  { %v129_v35 = vmax.f32 %v128_v34, 0.0 }
 0x192   :  { %v130_v36 = vpack.c.bf16 %v129_v35, %v129_v35 }
 0x194   :  { %433 = vmatmul.mubr.bf16.vlgmr.msra.gmra.mrb[0].mxu1 %v130_v36 }
 0x267   :  { %v234_v38 = vpop.f32.mrb[0].mxu1 }
 0x268   :  { %v235_v39 = vadd.f32 %v375_v37, %v234_v38  ;;  %v434_v40 = vpop.f32.mrb[1].mxu1 }
 0x269   :  { %v237_v41 = vpop.f32.mrb[2].mxu1 }
 0x26a   :  { %v435_v42 = vpop.f32.mrb[3].mxu1  ;;  %v242_v43 = vsel %vm60_vm1, %v235_v39, 0.0  ;;  %v245_v44 = vmul.f32 %v235_v39, %v235_v39 }
 0x26b   :  { %243 = vadd.xlane.f32.xlu1 %v242_v43 }
 0x26c   :  { %v246_v45 = vsel %vm60_vm1, %v245_v44, 0.0 }
 0x26f   :  { %247 = vadd.xlane.f32.xlu1 %v246_v45 }
 0x2f8   :  { %v244_v48 = vpop.xlane.xlu1 %243 }
 0x2f9   :  { %v249_v49 = vmul.f32 0.015625, %v244_v48 }
 0x2fb   :  { %v251_v51 = vmul.f32 %v249_v49, %v249_v49  ;;  %v253_v55 = vsub.f32 %v235_v39, %v249_v49 }
 0x2fc   :  { %v248_v50 = vpop.xlane.xlu1 %247 }
 0x2fd   :  { %v250_v52 = vmul.f32 0.015625, %v248_v50 }
 0x2ff   :  { %v252_v53 = vsub.f32 %v250_v52, %v251_v51 }
 0x301   :  { %v254_v54 = vadd.f32 1e-05, %v252_v53 }
 0x303   :  { %460 = vrsqrt.f32 %v254_v54 }
 0x30d   :  { %v461_v56 = vpop.eup %460 }
 0x30e   :  { %v256_v58 = vmul.f32 %v461_v56, %v253_v55 }
 0x310   :  { %v261_v60 = vmul.f32 %v384_v57, %v256_v58 }
 0x312   :  { %v266_v61 = vadd.f32 %v385_v59, %v261_v60 }
 0x314   :  { %v267_v62 = vmax.f32 %v266_v61, 0.0 }
 0x316   :  { %437 = vmatpush3.xpose.msk.msra.mxu0 %vm60_vm1, %v267_v62 }
 0x319   :  { %439 = vmatmul.mubr.msk.f32.vlgmr.msra.gmra.mrb[4].mxu0 %vm60_vm1, %v268_v63 }
 0x3ec   :  { %v347_v1 = vpop.f32.mrb[4].mxu0 }
 0x3ed   :  { %v348_v2 = vadd.f32 %v347_v1, %v273_v0  ;;  %v440_v3 = vpop.f32.mrb[5].mxu0 }
 0x3ef   :  { %352 = vst.msk [vmem:[#allocation2] sm:$0x1] %vm351_vm2, %v348_v2 }
 0x3f0   :  { %473 = shalt.err (!%p470_p4)
}
 0x3f1   :  { %s474_s9 = scalar_lea.hbm %s608_s5, 16 }
 0x3f2   :  { %p475_p5 = scmp.ne.s32.totalorder %s608_s5, %s474_s9  ;;  %p478_p6 = scmp.lt.u32.totalorder %s474_s9, %s608_s5 }
 0x3f4   :  { %p480_p7 = pnand %p478_p6, %p475_p5 }
 0x3f6   :  { %483 = shalt.err (!%p480_p7)
}
 0x3f7   :  { %362 = dma.vmem_to_hbm [thread:$0]  %s360_s30, 16, %s608_s5, [#allocation3]  }
 0x3f8   :  { %484 = dma.done.wait [#allocation3], 16  }
 0x3f9   :  { %485 = vsyncadd [#allocation3], 4294967280 }
 0x3fa   :  { %366 = vsyncpa [#allocation3], 1 }

</bundles_post_ra>
